<compile_context>
chip_gen: v6e
topology: v6e:2x2x1
jax: 0.10.0
libtpu: 0.0.40
codegen_flags: <defaults>
</compile_context>

<pallas_src>
import jax
import jax.numpy as jnp
from jax.experimental import pallas as pl
from jax.experimental.pallas import tpu as pltpu

INPUT_SIZE = 10
HIDDEN_SIZES = [128, 64, 32]


def _round_up(n, m):
    return ((n + m - 1) // m) * m


def attack_mlp_kernel(x_ref,
                      w1_ref, s1_ref, t1_ref,
                      w2_ref, s2_ref, t2_ref,
                      w3_ref, s3_ref, t3_ref,
                      w4_ref, b4_ref,
                      o_ref):
    """One batch tile.  Layout: (features, batch); batch on the lane axis."""
    bf16 = jnp.bfloat16

    x = x_ref[...]                                             # (10, TB) bf16

    # ---- block 1: Linear(10 -> 128) + folded(BN, bias) + ReLU
    h = jnp.dot(w1_ref[...], x, preferred_element_type=jnp.float32)
    h = jnp.maximum(h * s1_ref[...] + t1_ref[...], 0.0)
    # TODO(synk): Dropout is eval-mode identity; training-mode dropout would use
    # pltpu.prng_seed + pltpu.stateful_bernoulli.

    # ---- block 2: Linear(128 -> 64) + folded(BN, bias) + ReLU
    h = jnp.dot(w2_ref[...], h.astype(bf16), preferred_element_type=jnp.float32)
    h = jnp.maximum(h * s2_ref[...] + t2_ref[...], 0.0)

    # ---- block 3: Linear(64 -> 32) + folded(BN, bias) + ReLU
    h = jnp.dot(w3_ref[...], h.astype(bf16), preferred_element_type=jnp.float32)
    h = jnp.maximum(h * s3_ref[...] + t3_ref[...], 0.0)

    # ---- head: Linear(32 -> 1) + Sigmoid, as VPU mul + sublane reduce
    logit = jnp.sum(h * w4_ref[...], axis=0, keepdims=True) + b4_ref[...]
    o_ref[...] = jax.nn.sigmoid(logit).astype(o_ref.dtype)     # (1, TB) lane-dense


def init_params(key):
    """Deterministic params with PyTorch Linear/BatchNorm1d shapes."""
    sizes = [INPUT_SIZE] + HIDDEN_SIZES + [1]
    params = {}
    n_lin = len(sizes) - 1
    keys = jax.random.split(key, 2 * n_lin + 4 * len(HIDDEN_SIZES))
    ki = 0
    for i in range(n_lin):
        fan_in, fan_out = sizes[i], sizes[i + 1]
        bound = fan_in ** -0.5
        params[f"w{i+1}"] = jax.random.uniform(
            keys[ki], (fan_out, fan_in), jnp.float32, -bound, bound); ki += 1
        params[f"b{i+1}"] = jax.random.uniform(
            keys[ki], (fan_out,), jnp.float32, -bound, bound); ki += 1
    for i, h in enumerate(HIDDEN_SIZES):
        params[f"gamma{i+1}"] = 1.0 + 0.1 * jax.random.normal(keys[ki], (h,), jnp.float32); ki += 1
        params[f"beta{i+1}"]  = 0.1 * jax.random.normal(keys[ki], (h,), jnp.float32); ki += 1
        params[f"mean{i+1}"]  = 0.1 * jax.random.normal(keys[ki], (h,), jnp.float32); ki += 1
        params[f"var{i+1}"]   = jnp.abs(1.0 + 0.1 * jax.random.normal(keys[ki], (h,), jnp.float32)); ki += 1
    return params


def fold_bn(gamma, beta, mean, var, eps=1e-5):
    """Fold eval-mode BatchNorm into per-feature scale/shift."""
    scale = gamma * jax.lax.rsqrt(var + eps)
    shift = beta - mean * scale
    return scale, shift


def attack_mlp_forward(x, params, block_batch=2048):
    """Fused AttackMLP forward on x of shape (B, 10); returns (B, 1) f32."""
    B = x.shape[0]
    f32, bf16 = jnp.float32, jnp.bfloat16

    # Fold eval BN and the Linear bias into one per-feature (scale, shift),
    # stored as (F, 1) columns so they broadcast over the lane (batch) axis.
    def affine(i):
        s, t = fold_bn(params[f"gamma{i}"], params[f"beta{i}"],
                       params[f"mean{i}"], params[f"var{i}"])
        t = params[f"b{i}"] * s + t            # fold Linear bias into the shift
        return s.reshape(-1, 1).astype(f32), t.reshape(-1, 1).astype(f32)

    s1, t1 = affine(1)
    s2, t2 = affine(2)
    s3, t3 = affine(3)

    w1 = params["w1"].astype(bf16)             # (128, 10)
    w2 = params["w2"].astype(bf16)             # (64, 128)
    w3 = params["w3"].astype(bf16)             # (32, 64)
    w4 = params["w4"].reshape(-1, 1).astype(f32)   # (32, 1) column for VPU head
    b4 = params["b4"].reshape(1, 1).astype(f32)

    # Batch tiling: batch is on the lane axis, so multi-tile runs need
    # 128-aligned tiles; a small batch uses a single full-extent tile.
    if B <= 128:
        TB, Bp = B, B
    else:
        TB = min(_round_up(block_batch, 128), _round_up(B, 128))
        Bp = _round_up(B, TB)

    x_t = x.T.astype(bf16)                     # (10, B): batch on lanes
    if Bp != B:
        x_t = jnp.pad(x_t, ((0, 0), (0, Bp - B)))

    grid = (Bp // TB,)

    def const(shape):                          # VMEM-resident operand
        return pl.BlockSpec(shape, lambda i: (0, 0))

    out = pl.pallas_call(
        attack_mlp_kernel,
        out_shape=jax.ShapeDtypeStruct((1, Bp), f32),
        grid=grid,
        in_specs=[
            pl.BlockSpec((INPUT_SIZE, TB), lambda i: (0, i)),   # streamed x tile
            const(w1.shape), const(s1.shape), const(t1.shape),
            const(w2.shape), const(s2.shape), const(t2.shape),
            const(w3.shape), const(s3.shape), const(t3.shape),
            const(w4.shape), const(b4.shape),
        ],
        out_specs=pl.BlockSpec((1, TB), lambda i: (0, i)),      # lane-dense out
        compiler_params=pltpu.CompilerParams(
            dimension_semantics=("parallel",)),                 # 2 TCs on v7x
    )(x_t, w1, s1, t1, w2, s2, t2, w3, s3, t3, w4, b4)

    return out[:, :B].T                        # back to (B, 1)


def reference_forward(x, params):
    """Pure-JAX f32 reference (PyTorch layout / semantics)."""
    h = x
    for i in range(1, 4):
        h = h @ params[f"w{i}"].T + params[f"b{i}"]
        s, t = fold_bn(params[f"gamma{i}"], params[f"beta{i}"],
                       params[f"mean{i}"], params[f"var{i}"])
        h = jnp.maximum(h * s + t, 0.0)
    logit = h @ params["w4"].T + params["b4"]
    return jax.nn.sigmoid(logit)


if __name__ == "__main__":
    key = jax.random.PRNGKey(0)
    pkey, xkey, xkey2 = jax.random.split(key, 3)
    params = init_params(pkey)

    # Small batch: single-tile path.
    batch = 8
    x = jax.nn.softmax(jax.random.normal(xkey, (batch, INPUT_SIZE), jnp.float32), axis=-1)
    out = jax.block_until_ready(attack_mlp_forward(x, params))
    ref = reference_forward(x, params)
    assert out.shape == (batch, 1)
    assert jnp.allclose(out, ref, atol=2e-2, rtol=2e-2), (out, ref)

    # Larger, non-multiple-of-tile batch: exercises the grid + padding path.
    batch2 = 300
    x2 = jax.nn.softmax(jax.random.normal(xkey2, (batch2, INPUT_SIZE), jnp.float32), axis=-1)
    out2 = jax.block_until_ready(attack_mlp_forward(x2, params, block_batch=128))
    ref2 = reference_forward(x2, params)
    assert out2.shape == (batch2, 1)
    assert jnp.allclose(out2, ref2, atol=2e-2, rtol=2e-2), (out2, ref2)

    print("KERNEL_OK")
</pallas_src>

<mosaic_0001>
module attributes {stable_mosaic.version = 11 : i64} {
  func.func @attack_mlp_kernel(%arg0: i32, %arg1: memref<10x8xbf16, #tpu.memory_space<vmem>>, %arg2: memref<128x10xbf16, #tpu.memory_space<vmem>>, %arg3: memref<128x1xf32, #tpu.memory_space<vmem>>, %arg4: memref<128x1xf32, #tpu.memory_space<vmem>>, %arg5: memref<64x128xbf16, #tpu.memory_space<vmem>>, %arg6: memref<64x1xf32, #tpu.memory_space<vmem>>, %arg7: memref<64x1xf32, #tpu.memory_space<vmem>>, %arg8: memref<32x64xbf16, #tpu.memory_space<vmem>>, %arg9: memref<32x1xf32, #tpu.memory_space<vmem>>, %arg10: memref<32x1xf32, #tpu.memory_space<vmem>>, %arg11: memref<32x1xf32, #tpu.memory_space<vmem>>, %arg12: memref<1x1xf32, #tpu.memory_space<vmem>>, %arg13: memref<1x8xf32, #tpu.memory_space<vmem>>) attributes {dimension_semantics = [#tpu.dimension_semantics<parallel>], iteration_bounds = array<i64: 1>, scalar_prefetch = 0 : i64, scratch_operands = 0 : i64, tpu.core_type = #tpu.core_type<tc>, window_params = [{transform_indices = @transform_0, window_bounds = array<i64: 10, 8>}, {pipeline_mode = #tpu.pipeline_mode<synchronous>, transform_indices = @transform_1, window_bounds = array<i64: 128, 10>}, {pipeline_mode = #tpu.pipeline_mode<synchronous>, transform_indices = @transform_2, window_bounds = array<i64: 128, 1>}, {pipeline_mode = #tpu.pipeline_mode<synchronous>, transform_indices = @transform_3, window_bounds = array<i64: 128, 1>}, {pipeline_mode = #tpu.pipeline_mode<synchronous>, transform_indices = @transform_4, window_bounds = array<i64: 64, 128>}, {pipeline_mode = #tpu.pipeline_mode<synchronous>, transform_indices = @transform_5, window_bounds = array<i64: 64, 1>}, {pipeline_mode = #tpu.pipeline_mode<synchronous>, transform_indices = @transform_6, window_bounds = array<i64: 64, 1>}, {pipeline_mode = #tpu.pipeline_mode<synchronous>, transform_indices = @transform_7, window_bounds = array<i64: 32, 64>}, {pipeline_mode = #tpu.pipeline_mode<synchronous>, transform_indices = @transform_8, window_bounds = array<i64: 32, 1>}, {pipeline_mode = #tpu.pipeline_mode<synchronous>, transform_indices = @transform_9, window_bounds = array<i64: 32, 1>}, {pipeline_mode = #tpu.pipeline_mode<synchronous>, transform_indices = @transform_10, window_bounds = array<i64: 32, 1>}, {pipeline_mode = #tpu.pipeline_mode<synchronous>, transform_indices = @transform_11, window_bounds = array<i64: 1, 1>}, {transform_indices = @transform_12, window_bounds = array<i64: 1, 8>}]} {
    %c0 = arith.constant 0 : index
    %c0_0 = arith.constant 0 : index
    %0 = vector.load %arg1[%c0, %c0_0] : memref<10x8xbf16, #tpu.memory_space<vmem>>, vector<10x8xbf16>
    %c0_1 = arith.constant 0 : index
    %c0_2 = arith.constant 0 : index
    %1 = vector.load %arg2[%c0_1, %c0_2] : memref<128x10xbf16, #tpu.memory_space<vmem>>, vector<128x10xbf16>
    %cst = arith.constant dense<0.000000e+00> : vector<128x8xf32>
    %2 = tpu.matmul %1, %0, %cst {dimension_numbers = #tpu.dot_dimension_numbers<[1], [0], [0], [1], [0, 0, 1, 1], [], []>} : vector<128x10xbf16>, vector<10x8xbf16>, vector<128x8xf32> -> vector<128x8xf32>
    %c0_3 = arith.constant 0 : index
    %c0_4 = arith.constant 0 : index
    %3 = vector.load %arg3[%c0_3, %c0_4] : memref<128x1xf32, #tpu.memory_space<vmem>>, vector<128x1xf32>
    %4 = vector.broadcast %3 : vector<128x1xf32> to vector<128x8xf32>
    %5 = arith.mulf %2, %4 : vector<128x8xf32>
    %c0_5 = arith.constant 0 : index
    %c0_6 = arith.constant 0 : index
    %6 = vector.load %arg4[%c0_5, %c0_6] : memref<128x1xf32, #tpu.memory_space<vmem>>, vector<128x1xf32>
    %7 = vector.broadcast %6 : vector<128x1xf32> to vector<128x8xf32>
    %8 = arith.addf %5, %7 : vector<128x8xf32>
    %cst_7 = arith.constant 0.000000e+00 : f32
    %9 = vector.broadcast %cst_7 : f32 to vector<128x8xf32>
    %10 = arith.maximumf %8, %9 : vector<128x8xf32>
    %c0_8 = arith.constant 0 : index
    %c0_9 = arith.constant 0 : index
    %11 = vector.load %arg5[%c0_8, %c0_9] : memref<64x128xbf16, #tpu.memory_space<vmem>>, vector<64x128xbf16>
    %12 = arith.truncf %10 : vector<128x8xf32> to vector<128x8xbf16>
    %cst_10 = arith.constant dense<0.000000e+00> : vector<64x8xf32>
    %13 = tpu.matmul %11, %12, %cst_10 {dimension_numbers = #tpu.dot_dimension_numbers<[1], [0], [0], [1], [0, 0, 1, 1], [], []>} : vector<64x128xbf16>, vector<128x8xbf16>, vector<64x8xf32> -> vector<64x8xf32>
    %c0_11 = arith.constant 0 : index
    %c0_12 = arith.constant 0 : index
    %14 = vector.load %arg6[%c0_11, %c0_12] : memref<64x1xf32, #tpu.memory_space<vmem>>, vector<64x1xf32>
    %15 = vector.broadcast %14 : vector<64x1xf32> to vector<64x8xf32>
    %16 = arith.mulf %13, %15 : vector<64x8xf32>
    %c0_13 = arith.constant 0 : index
    %c0_14 = arith.constant 0 : index
    %17 = vector.load %arg7[%c0_13, %c0_14] : memref<64x1xf32, #tpu.memory_space<vmem>>, vector<64x1xf32>
    %18 = vector.broadcast %17 : vector<64x1xf32> to vector<64x8xf32>
    %19 = arith.addf %16, %18 : vector<64x8xf32>
    %cst_15 = arith.constant 0.000000e+00 : f32
    %20 = vector.broadcast %cst_15 : f32 to vector<64x8xf32>
    %21 = arith.maximumf %19, %20 : vector<64x8xf32>
    %c0_16 = arith.constant 0 : index
    %c0_17 = arith.constant 0 : index
    %22 = vector.load %arg8[%c0_16, %c0_17] : memref<32x64xbf16, #tpu.memory_space<vmem>>, vector<32x64xbf16>
    %23 = arith.truncf %21 : vector<64x8xf32> to vector<64x8xbf16>
    %cst_18 = arith.constant dense<0.000000e+00> : vector<32x8xf32>
    %24 = tpu.matmul %22, %23, %cst_18 {dimension_numbers = #tpu.dot_dimension_numbers<[1], [0], [0], [1], [0, 0, 1, 1], [], []>} : vector<32x64xbf16>, vector<64x8xbf16>, vector<32x8xf32> -> vector<32x8xf32>
    %c0_19 = arith.constant 0 : index
    %c0_20 = arith.constant 0 : index
    %25 = vector.load %arg9[%c0_19, %c0_20] : memref<32x1xf32, #tpu.memory_space<vmem>>, vector<32x1xf32>
    %26 = vector.broadcast %25 : vector<32x1xf32> to vector<32x8xf32>
    %27 = arith.mulf %24, %26 : vector<32x8xf32>
    %c0_21 = arith.constant 0 : index
    %c0_22 = arith.constant 0 : index
    %28 = vector.load %arg10[%c0_21, %c0_22] : memref<32x1xf32, #tpu.memory_space<vmem>>, vector<32x1xf32>
    %29 = vector.broadcast %28 : vector<32x1xf32> to vector<32x8xf32>
    %30 = arith.addf %27, %29 : vector<32x8xf32>
    %cst_23 = arith.constant 0.000000e+00 : f32
    %31 = vector.broadcast %cst_23 : f32 to vector<32x8xf32>
    %32 = arith.maximumf %30, %31 : vector<32x8xf32>
    %c0_24 = arith.constant 0 : index
    %c0_25 = arith.constant 0 : index
    %33 = vector.load %arg11[%c0_24, %c0_25] : memref<32x1xf32, #tpu.memory_space<vmem>>, vector<32x1xf32>
    %34 = vector.broadcast %33 : vector<32x1xf32> to vector<32x8xf32>
    %35 = arith.mulf %32, %34 : vector<32x8xf32>
    %cst_26 = arith.constant dense<0.000000e+00> : vector<8xf32>
    %36 = vector.multi_reduction <add>, %35, %cst_26 [0] : vector<32x8xf32> to vector<8xf32>
    %37 = vector.shape_cast %36 : vector<8xf32> to vector<1x8xf32>
    %c0_27 = arith.constant 0 : index
    %c0_28 = arith.constant 0 : index
    %38 = vector.load %arg12[%c0_27, %c0_28] : memref<1x1xf32, #tpu.memory_space<vmem>>, vector<1x1xf32>
    %39 = vector.broadcast %38 : vector<1x1xf32> to vector<1x8xf32>
    %40 = arith.addf %37, %39 : vector<1x8xf32>
    %41 = arith.negf %40 : vector<1x8xf32>
    %42 = math.exp %41 : vector<1x8xf32>
    %cst_29 = arith.constant 1.000000e+00 : f32
    %43 = vector.broadcast %cst_29 : f32 to vector<1x8xf32>
    %44 = arith.addf %43, %42 : vector<1x8xf32>
    %45 = arith.divf %43, %44 : vector<1x8xf32>
    %c0_30 = arith.constant 0 : index
    %c0_31 = arith.constant 0 : index
    %46 = vector.load %arg13[%c0_30, %c0_31] : memref<1x8xf32, #tpu.memory_space<vmem>>, vector<1x8xf32>
    tpu.vector_store %arg13[%c0_30, %c0_31], %45 {strides = array<i32>} : memref<1x8xf32, #tpu.memory_space<vmem>>, vector<1x8xf32>,
    return
  }
  func.func @transform_0(%arg0: i32) -> (i32, i32) {
    %c0_i32 = arith.constant 0 : i32
    %c0_i32_0 = arith.constant 0 : i32
    return %c0_i32, %arg0 : i32, i32
  }
  func.func @transform_1(%arg0: i32) -> (i32, i32) {
    %c0_i32 = arith.constant 0 : i32
    %c0_i32_0 = arith.constant 0 : i32
    %c0_i32_1 = arith.constant 0 : i32
    return %c0_i32, %c0_i32_0 : i32, i32
  }
  func.func @transform_2(%arg0: i32) -> (i32, i32) {
    %c0_i32 = arith.constant 0 : i32
    %c0_i32_0 = arith.constant 0 : i32
    %c0_i32_1 = arith.constant 0 : i32
    return %c0_i32, %c0_i32_0 : i32, i32
  }
  func.func @transform_3(%arg0: i32) -> (i32, i32) {
    %c0_i32 = arith.constant 0 : i32
    %c0_i32_0 = arith.constant 0 : i32
    %c0_i32_1 = arith.constant 0 : i32
    return %c0_i32, %c0_i32_0 : i32, i32
  }
  func.func @transform_4(%arg0: i32) -> (i32, i32) {
    %c0_i32 = arith.constant 0 : i32
    %c0_i32_0 = arith.constant 0 : i32
    %c0_i32_1 = arith.constant 0 : i32
    return %c0_i32, %c0_i32_0 : i32, i32
  }
  func.func @transform_5(%arg0: i32) -> (i32, i32) {
    %c0_i32 = arith.constant 0 : i32
    %c0_i32_0 = arith.constant 0 : i32
    %c0_i32_1 = arith.constant 0 : i32
    return %c0_i32, %c0_i32_0 : i32, i32
  }
  func.func @transform_6(%arg0: i32) -> (i32, i32) {
    %c0_i32 = arith.constant 0 : i32
    %c0_i32_0 = arith.constant 0 : i32
    %c0_i32_1 = arith.constant 0 : i32
    return %c0_i32, %c0_i32_0 : i32, i32
  }
  func.func @transform_7(%arg0: i32) -> (i32, i32) {
    %c0_i32 = arith.constant 0 : i32
    %c0_i32_0 = arith.constant 0 : i32
    %c0_i32_1 = arith.constant 0 : i32
    return %c0_i32, %c0_i32_0 : i32, i32
  }
  func.func @transform_8(%arg0: i32) -> (i32, i32) {
    %c0_i32 = arith.constant 0 : i32
    %c0_i32_0 = arith.constant 0 : i32
    %c0_i32_1 = arith.constant 0 : i32
    return %c0_i32, %c0_i32_0 : i32, i32
  }
  func.func @transform_9(%arg0: i32) -> (i32, i32) {
    %c0_i32 = arith.constant 0 : i32
    %c0_i32_0 = arith.constant 0 : i32
    %c0_i32_1 = arith.constant 0 : i32
    return %c0_i32, %c0_i32_0 : i32, i32
  }
  func.func @transform_10(%arg0: i32) -> (i32, i32) {
    %c0_i32 = arith.constant 0 : i32
    %c0_i32_0 = arith.constant 0 : i32
    %c0_i32_1 = arith.constant 0 : i32
    return %c0_i32, %c0_i32_0 : i32, i32
  }
  func.func @transform_11(%arg0: i32) -> (i32, i32) {
    %c0_i32 = arith.constant 0 : i32
    %c0_i32_0 = arith.constant 0 : i32
    %c0_i32_1 = arith.constant 0 : i32
    return %c0_i32, %c0_i32_0 : i32, i32
  }
  func.func @transform_12(%arg0: i32) -> (i32, i32) {
    %c0_i32 = arith.constant 0 : i32
    %c0_i32_0 = arith.constant 0 : i32
    return %c0_i32, %arg0 : i32, i32
  }
}

</mosaic_0001>

<bundles_post_ra>
// kernel: tpu_custom_call.1
= control target key start
LH: loop header
LB: loop body
LE: loop exit
PB: predicated region body
PF: predicated region fallthrough
CT: control target
= control target key end

     0   :  { %s1381_s0 = inlined_call_operand.vmem [shape: bf16[10,8], index: 0, kind: input, shape index: {}]   ;;  %s1382_s1 = inlined_call_operand.vmem [shape: bf16[128,10], index: 1, kind: input, shape index: {}]   ;;  %s1383_s2 = inlined_call_operand.vmem [shape: f32[128,1], index: 2, kind: input, shape index: {}]   ;;  %s1384_s3 = inlined_call_operand.vmem [shape: f32[128,1], index: 3, kind: input, shape index: {}]   ;;  %s1385_s4 = inlined_call_operand.vmem [shape: bf16[64,128], index: 4, kind: input, shape index: {}]   ;;  %s1386_s5 = inlined_call_operand.vmem [shape: f32[64,1], index: 5, kind: input, shape index: {}]   ;;  %s1387_s6 = inlined_call_operand.vmem [shape: f32[64,1], index: 6, kind: input, shape index: {}]   ;;  %s1388_s7 = inlined_call_operand.vmem [shape: bf16[32,64], index: 7, kind: input, shape index: {}]   ;;  %s1389_s8 = inlined_call_operand.vmem [shape: f32[32,1], index: 8, kind: input, shape index: {}]   ;;  %s1390_s9 = inlined_call_operand.vmem [shape: f32[32,1], index: 9, kind: input, shape index: {}]   ;;  %s1391_s10 = inlined_call_operand.vmem [shape: f32[32,1], index: 10, kind: input, shape index: {}]   ;;  %s1392_s11 = inlined_call_operand.<no memory space> [shape: f32[1,1], index: 11, kind: input, shape index: {}]   ;;  %s1393_s12 = inlined_call_operand.hbm [shape: f32[1,8], index: 12, kind: output, shape index: {}]  }
   0x1   :  { %v17_v0 = vstv %s1392_s11 }
   0x2   :  { %18 = vst [vmem:[#allocation2] sm:$0x1] %v17_v0 }
   0x3   :  { %v360_v1 = vld [vmem:[%s1384_s3 + $0x70] sm:$0xff]  ;;  %vm133_vm0 = vcmask 1044480   ;;  %v1061_v3 = vmov 0   ;;  %v1020_v4 = vld [vmem:[%s1381_s0] sm:$0x1f]   ;;  %v361_v5 = vld [vmem:[%s1384_s3 + $0x78] sm:$0xff] }
   0x4   :  { %v248_v2 = vld [vmem:[%s1383_s2 + $0x70] sm:$0xff]  ;;  %1019 = vset.pattern.permute.xlu1 %v1061_v3  ;;  %1018 = vset.pattern.permute.xlu0 %v1061_v3  ;;  %v249_v6 = vld [vmem:[%s1383_s2 + $0x78] sm:$0xff]  ;;  %vm108_vm1 = vcmask 80896   ;;  %v135_v7 = vsel %vm133_vm0, %v1020_v4, 0  ;;  %v1021_v8 = vld [vmem:[%s1382_s1] sm:$0xff]  }
   0x5   :  { %434 = vperm.xlu1 %1019, %v360_v1   ;;  %322 = vperm.xlu0 %1018, %v248_v2   ;;  %v1022_v9 = vld [vmem:[%s1382_s1 + $0x8] sm:$0xff]   ;;  %v1023_v10 = vld [vmem:[%s1382_s1 + $0x10] sm:$0xff]   ;;  %v246_v12 = vld [vmem:[%s1383_s2 + $0x60] sm:$0xff] }
   0x6   :  { %1015 = vmatprep.subr.msk.bf16.mxu0 %vm133_vm0, %v1020_v4  ;;  %963 = vmatprep.mubr.msk.bf16.mxu0 %vm108_vm1, %v1021_v8  ;;  %v247_v11 = vld [vmem:[%s1383_s2 + $0x68] sm:$0xff]  ;;  %v358_v14 = vld [vmem:[%s1384_s3 + $0x60] sm:$0xff]  ;;  %v1024_v15 = vld [vmem:[%s1382_s1 + $0x18] sm:$0xff]  }
   0x7   :  { %962 = vmatpush3.bf16.msra.mxu0 %v135_v7  ;;  %v359_v13 = vld [vmem:[%s1384_s3 + $0x68] sm:$0xff]  ;;  %v1025_v16 = vld [vmem:[%s1382_s1 + $0x20] sm:$0xff]   ;;  %v245_v17 = vld [vmem:[%s1383_s2 + $0x58] sm:$0xff] }
   0x8   :  { %v244_v18 = vld [vmem:[%s1383_s2 + $0x50] sm:$0xff]  ;;  %v357_v19 = vld [vmem:[%s1384_s3 + $0x58] sm:$0xff]  ;;  %v1026_v21 = vld [vmem:[%s1382_s1 + $0x28] sm:$0xff]  }
   0x9   :  { %439 = vperm.xlu1 %1019, %v361_v5   ;;  %327 = vperm.xlu0 %1018, %v249_v6   ;;  %v356_v20 = vld [vmem:[%s1384_s3 + $0x50] sm:$0xff]  ;;  %v243_v23 = vld [vmem:[%s1383_s2 + $0x48] sm:$0xff]  ;;  %v242_v24 = vld [vmem:[%s1383_s2 + $0x40] sm:$0xff] }
   0xa   :  { %964 = vmatmul.mubr.msk.bf16.vlgmr.msra.gmra.mxu0 %vm108_vm1, %v1022_v9  ;;  %v1027_v22 = vld [vmem:[%s1382_s1 + $0x30] sm:$0xff]   ;;  %v355_v25 = vld [vmem:[%s1384_s3 + $0x48] sm:$0xff]  ;;  %v354_v26 = vld [vmem:[%s1384_s3 + $0x40] sm:$0xff] }
   0xb   :  { %967 = vmatprep.mubr.msk.bf16.mxu0 %vm108_vm1, %v1023_v10  ;;  %v1028_v27 = vld [vmem:[%s1382_s1 + $0x38] sm:$0xff]   ;;  %v240_v29 = vld [vmem:[%s1383_s2 + $0x30] sm:$0xff] }
   0xc   :  { %v241_v28 = vld [vmem:[%s1383_s2 + $0x38] sm:$0xff] }
   0xd   :  { %317 = vperm.xlu1 %1019, %v247_v11   ;;  %312 = vperm.xlu0 %1018, %v246_v12  }
  0x11   :  { %429 = vperm.xlu1 %1019, %v359_v13   ;;  %424 = vperm.xlu0 %1018, %v358_v14  }
  0x12   :  { %968 = vmatmul.mubr.msk.bf16.gmra.mxu0 %vm108_vm1, %v1024_v15 }
  0x13   :  { %971 = vmatprep.mubr.msk.bf16.mxu0 %vm108_vm1, %v1025_v16 }
  0x15   :  { %307 = vperm.xlu1 %1019, %v245_v17   ;;  %302 = vperm.xlu0 %1018, %v244_v18  }
  0x19   :  { %419 = vperm.xlu1 %1019, %v357_v19   ;;  %414 = vperm.xlu0 %1018, %v356_v20  }
  0x1a   :  { %972 = vmatmul.mubr.msk.bf16.gmra.mxu0 %vm108_vm1, %v1026_v21 }
  0x1b   :  { %975 = vmatprep.mubr.msk.bf16.mxu0 %vm108_vm1, %v1027_v22 }
  0x1d   :  { %297 = vperm.xlu1 %1019, %v243_v23   ;;  %292 = vperm.xlu0 %1018, %v242_v24  }
  0x21   :  { %409 = vperm.xlu1 %1019, %v355_v25   ;;  %404 = vperm.xlu0 %1018, %v354_v26  }
  0x22   :  { %976 = vmatmul.mubr.msk.bf16.gmra.mxu0 %vm108_vm1, %v1028_v27 }
  0x23   :  { %19 = vsyncpa [#allocation4], 0  ;;  %v353_v30 = vld [vmem:[%s1384_s3 + $0x38] sm:$0xff]  ;;  %v352_v31 = vld [vmem:[%s1384_s3 + $0x30] sm:$0xff]  ;;  %vm717_vm2 = vcmask 523264   ;;  %vm861_vm3 = vcmask 64512  }
  0x24   :  { %v239_v32 = vld [vmem:[%s1383_s2 + $0x28] sm:$0xff]  ;;  %v238_v33 = vld [vmem:[%s1383_s2 + $0x20] sm:$0xff]  ;;  %v237_v36 = vld [vmem:[%s1383_s2 + $0x18] sm:$0xff]  ;;  %vm892_vm4 = vcmask 57344  }
  0x25   :  { %287 = vperm.xlu1 %1019, %v241_v28   ;;  %282 = vperm.xlu0 %1018, %v240_v29   ;;  %v351_v34 = vld [vmem:[%s1384_s3 + $0x28] sm:$0xff]  ;;  %v350_v35 = vld [vmem:[%s1384_s3 + $0x20] sm:$0xff]  ;;  %v236_v37 = vld [vmem:[%s1383_s2 + $0x10] sm:$0xff] }
  0x26   :  { %v349_v38 = vld [vmem:[%s1384_s3 + $0x18] sm:$0xff]  ;;  %v348_v39 = vld [vmem:[%s1384_s3 + $0x10] sm:$0xff]  ;;  %v235_v40 = vld [vmem:[%s1383_s2 + $0x8] sm:$0xff] }
  0x27   :  { %v234_v41 = vld [vmem:[%s1383_s2] sm:$0xff]  ;;  %v347_v42 = vld [vmem:[%s1384_s3 + $0x8] sm:$0xff]  ;;  %v586_v44 = vld [vmem:[%s1386_s5 + $0x38] sm:$0xff] }
  0x28   :  { %v346_v43 = vld [vmem:[%s1384_s3] sm:$0xff]  ;;  %v585_v45 = vld [vmem:[%s1386_s5 + $0x30] sm:$0xff]  ;;  %v642_v46 = vld [vmem:[%s1387_s6 + $0x38] sm:$0xff] }
  0x29   :  { %399 = vperm.xlu1 %1019, %v353_v30   ;;  %394 = vperm.xlu0 %1018, %v352_v31   ;;  %v641_v47 = vld [vmem:[%s1387_s6 + $0x30] sm:$0xff]  ;;  %v584_v48 = vld [vmem:[%s1386_s5 + $0x28] sm:$0xff]  ;;  %v583_v49 = vld [vmem:[%s1386_s5 + $0x20] sm:$0xff] }
  0x2a   :  { %v640_v50 = vld [vmem:[%s1387_s6 + $0x28] sm:$0xff]  ;;  %v639_v51 = vld [vmem:[%s1387_s6 + $0x20] sm:$0xff]  ;;  %v582_v52 = vld [vmem:[%s1386_s5 + $0x18] sm:$0xff] }
  0x2b   :  { %v581_v53 = vld [vmem:[%s1386_s5 + $0x10] sm:$0xff]  ;;  %v638_v54 = vld [vmem:[%s1387_s6 + $0x18] sm:$0xff]  ;;  %v580_v56 = vld [vmem:[%s1386_s5 + $0x8] sm:$0xff] }
  0x2c   :  { %v637_v55 = vld [vmem:[%s1387_s6 + $0x10] sm:$0xff]  ;;  %v579_v57 = vld [vmem:[%s1386_s5] sm:$0xff]  ;;  %v636_v58 = vld [vmem:[%s1387_s6 + $0x8] sm:$0xff] }
  0x2d   :  { %277 = vperm.xlu1 %1019, %v239_v32   ;;  %272 = vperm.xlu0 %1018, %v238_v33   ;;  %v635_v59 = vld [vmem:[%s1387_s6] sm:$0xff]  ;;  %v774_v60 = vld [vmem:[%s1389_s8 + $0x8] sm:$0xff]  ;;  %v775_v63 = vld [vmem:[%s1389_s8 + $0x10] sm:$0xff] }
  0x2e   :  { %v773_v61 = vld [vmem:[%s1389_s8] sm:$0xff]  ;;  %v776_v0 = vld [vmem:[%s1389_s8 + $0x18] sm:$0xff]  ;;  %v802_v1 = vld [vmem:[%s1390_s9 + $0x8] sm:$0xff] }
  0x2f   :  { %v801_v62 = vld [vmem:[%s1390_s9] sm:$0xff]  ;;  %v804_v2 = vld [vmem:[%s1390_s9 + $0x18] sm:$0xff]  ;;  %v803_v3 = vld [vmem:[%s1390_s9 + $0x10] sm:$0xff] }
  0x30   :  { %v834_v4 = vld [vmem:[%s1391_s10 + $0x8] sm:$0xff]  ;;  %v833_v5 = vld [vmem:[%s1391_s10] sm:$0xff]  ;;  %v836_v6 = vld [vmem:[%s1391_s10 + $0x18] sm:$0xff] }
  0x31   :  { %389 = vperm.xlu1 %1019, %v351_v34   ;;  %384 = vperm.xlu0 %1018, %v350_v35   ;;  %v835_v7 = vld [vmem:[%s1391_s10 + $0x10] sm:$0xff]  ;;  %v875_v8 = vld [vmem:[#allocation2] sm:$0x1] }
  0x32   :  { %v1029_v9 = vld [vmem:[%s1385_s4] sm:$0xff]  }
  0x33   :  { %995 = vmatprep.mubr.bf16.mxu1 %v1029_v9 }
  0x35   :  { %267 = vperm.xlu1 %1019, %v237_v36   ;;  %262 = vperm.xlu0 %1018, %v236_v37  }
  0x39   :  { %379 = vperm.xlu1 %1019, %v349_v38   ;;  %374 = vperm.xlu0 %1018, %v348_v39  }
  0x3d   :  { %257 = vperm.xlu1 %1019, %v235_v40   ;;  %252 = vperm.xlu0 %1018, %v234_v41  }
  0x41   :  { %369 = vperm.xlu1 %1019, %v347_v42   ;;  %364 = vperm.xlu0 %1018, %v346_v43  }
  0x45   :  { %624 = vperm.xlu1 %1019, %v586_v44   ;;  %619 = vperm.xlu0 %1018, %v585_v45  }
  0x49   :  { %680 = vperm.xlu1 %1019, %v642_v46   ;;  %675 = vperm.xlu0 %1018, %v641_v47  }
  0x4d   :  { %614 = vperm.xlu1 %1019, %v584_v48   ;;  %609 = vperm.xlu0 %1018, %v583_v49  }
  0x51   :  { %670 = vperm.xlu1 %1019, %v640_v50   ;;  %665 = vperm.xlu0 %1018, %v639_v51  }
  0x55   :  { %604 = vperm.xlu1 %1019, %v582_v52   ;;  %599 = vperm.xlu0 %1018, %v581_v53  }
  0x59   :  { %660 = vperm.xlu1 %1019, %v638_v54   ;;  %655 = vperm.xlu0 %1018, %v637_v55  }
  0x5d   :  { %594 = vperm.xlu1 %1019, %v580_v56   ;;  %589 = vperm.xlu0 %1018, %v579_v57  }
  0x61   :  { %650 = vperm.xlu1 %1019, %v636_v58   ;;  %645 = vperm.xlu0 %1018, %v635_v59  }
  0x65   :  { %784 = vperm.xlu1 %1019, %v774_v60   ;;  %779 = vperm.xlu0 %1018, %v773_v61  }
  0x69   :  { %807 = vperm.xlu1 %1019, %v801_v62   ;;  %789 = vperm.xlu0 %1018, %v775_v63  }
  0x6d   :  { %794 = vperm.xlu1 %1019, %v776_v0   ;;  %812 = vperm.xlu0 %1018, %v802_v1  }
  0x71   :  { %822 = vperm.xlu1 %1019, %v804_v2   ;;  %817 = vperm.xlu0 %1018, %v803_v3  }
  0x75   :  { %844 = vperm.xlu1 %1019, %v834_v4   ;;  %839 = vperm.xlu0 %1018, %v833_v5  }
  0x79   :  { %854 = vperm.xlu1 %1019, %v836_v6   ;;  %849 = vperm.xlu0 %1018, %v835_v7  }
  0x7d   :  { %878 = vperm.xlu0 %1018, %v875_v8  }
  0x80   :  { %v435_v10 = vpop.permute.xlu1 %434  ;;  %v323_v11 = vpop.permute.xlu0 %322 }
  0x84   :  { %v440_v12 = vpop.permute.xlu1 %439  ;;  %v328_v13 = vpop.permute.xlu0 %327 }
  0x88   :  { %v318_v14 = vpop.permute.xlu1 %317  ;;  %v313_v15 = vpop.permute.xlu0 %312 }
  0x8c   :  { %v430_v16 = vpop.permute.xlu1 %429  ;;  %v425_v17 = vpop.permute.xlu0 %424 }
  0x90   :  { %v308_v18 = vpop.permute.xlu1 %307  ;;  %v303_v19 = vpop.permute.xlu0 %302 }
  0x94   :  { %v420_v20 = vpop.permute.xlu1 %419  ;;  %v415_v21 = vpop.permute.xlu0 %414 }
  0x98   :  { %v298_v22 = vpop.permute.xlu1 %297  ;;  %v293_v24 = vpop.permute.xlu0 %292 }
  0x9c   :  { %v410_v26 = vpop.permute.xlu1 %409  ;;  %v405_v28 = vpop.permute.xlu0 %404 }
  0xa0   :  { %v288_v31 = vpop.permute.xlu1 %287  ;;  %v283_v33 = vpop.permute.xlu0 %282 }
  0xa4   :  { %v400_v36 = vpop.permute.xlu1 %399  ;;  %v395_v38 = vpop.permute.xlu0 %394 }
  0xa8   :  { %v278_v41 = vpop.permute.xlu1 %277  ;;  %v273_v43 = vpop.permute.xlu0 %272 }
  0xac   :  { %v390_v48 = vpop.permute.xlu1 %389  ;;  %v385_v53 = vpop.permute.xlu0 %384 }
  0xb0   :  { %v268_v0 = vpop.permute.xlu1 %267  ;;  %v263_v6 = vpop.permute.xlu0 %262 }
  0xca   :  { %v1349_v23 = vpop.f32.mrf.mxu0 }
  0xcc   :  { %v1351_v25 = vpop.f32.mrf.mxu0 }
  0xce   :  { %v1353_v27 = vpop.f32.mrf.mxu0 }
  0xd0   :  { %v1355_v29 = vpop.f32.mrf.mxu0 }
  0xd2   :  { %v969_v30 = vpop.f32.mrf.mxu0 }
  0xd4   :  { %v187_v32 = vpop.f32.mrf.mxu0 }
  0xd6   :  { %v970_v34 = vpop.f32.mrf.mxu0 }
  0xd7   :  { %v337_v7 = vmul.f32 %v970_v34, %v288_v31 }
  0xd8   :  { %v190_v35 = vpop.f32.mrf.mxu0 }
  0xda   :  { %v973_v37 = vpop.f32.mrf.mxu0 }
  0xdb   :  { %v340_v54 = vmul.f32 %v973_v37, %v303_v19  ;;  %v375_v19 = vpop.permute.xlu0 %374 }
  0xdc   :  { %v203_v39 = vpop.f32.mrf.mxu0 }
  0xdd   :  { %v452_v1 = vadd.f32 %v415_v21, %v340_v54  ;;  %v338_v2 = vmul.f32 %v293_v24, %v203_v39  ;;  %v334_v21 = vmul.f32 %v273_v43, %v187_v32  ;;  %v333_v24 = vmul.f32 %v1353_v27, %v268_v0 }
  0xde   :  { %v974_v40 = vpop.f32.mrf.mxu0 }
  0xdf   :  { %v341_v49 = vmul.f32 %v974_v40, %v308_v18 }
  0xe0   :  { %v206_v42 = vpop.f32.mrf.mxu0 }
  0xe1   :  { %v453_v59 = vadd.f32 %v420_v20, %v341_v49  ;;  %v339_v60 = vmul.f32 %v298_v22, %v206_v42 }
  0xe2   :  { %v977_v44 = vpop.f32.mrf.mxu0 }
  0xe3   :  { %v344_v45 = vmul.f32 %v977_v44, %v323_v11  ;;  %v469_v8 = vmax.f32 %v453_v59, 0.0  ;;  %v451_v9 = vadd.f32 %v410_v26, %v339_v60  ;;  %v336_v11 = vmul.f32 %v969_v30, %v283_v33 }
  0xe4   :  { %v219_v46 = vpop.f32.mrf.mxu0 }
  0xe5   :  { %v342_v47 = vmul.f32 %v313_v15, %v219_v46  ;;  %v456_v51 = vadd.f32 %v435_v10, %v344_v45  ;;  %v449_v15 = vadd.f32 %v400_v36, %v337_v7  ;;  %v448_v20 = vadd.f32 %v395_v38, %v336_v11 }
  0xe6   :  { %v978_v50 = vpop.f32.mrf.mxu0  ;;  %v446_v36 = vadd.f32 %v385_v53, %v334_v21  ;;  %v1033_v53 = vld [vmem:[%s1388_s7] sm:$0xff]  }
  0xe7   :  { %v345_v52 = vmul.f32 %v978_v50, %v328_v13  ;;  %v454_v56 = vadd.f32 %v425_v17, %v342_v47  ;;  %v472_v61 = vmax.f32 %v456_v51, 0.0  ;;  %v450_v13 = vadd.f32 %v405_v28, %v338_v2  ;;  %v1031_v51 = vld [vmem:[%s1385_s4 + $0x10] sm:$0xff]   ;;  %1011 = vmatprep.mubr.msk.bf16.mxu0 %vm717_vm2, %v1033_v53 }
  0xe8   :  { %v222_v55 = vpop.f32.mrf.mxu0  ;;  %v467_v17 = vmax.f32 %v451_v9, 0.0  ;;  %v465_v26 = vmax.f32 %v449_v15, 0.0  ;;  %v332_v28 = vmul.f32 %v1349_v23, %v263_v6  ;;  %v464_v33 = vmax.f32 %v448_v20, 0.0 }
  0xe9   :  { %v457_v57 = vadd.f32 %v440_v12, %v345_v52  ;;  %v343_v58 = vmul.f32 %v318_v14, %v222_v55  ;;  %v470_v3 = vmax.f32 %v454_v56, 0.0  ;;  %v468_v12 = vmax.f32 %v452_v1, 0.0  ;;  %v380_v14 = vpop.permute.xlu1 %379  ;;  %v1032_v52 = vld [vmem:[%s1385_s4 + $0x18] sm:$0xff]  }
  0xea   :  { %v466_v22 = vmax.f32 %v450_v13, 0.0  ;;  %v445_v37 = vadd.f32 %v380_v14, %v333_v24  ;;  %v485_v32 = vpack.c.bf16 %v465_v26, %v464_v33  ;;  %v444_v40 = vadd.f32 %v375_v19, %v332_v28 }
  0xeb   :  { %v473_v62 = vmax.f32 %v457_v57, 0.0  ;;  %v455_v63 = vadd.f32 %v430_v16, %v343_v58  ;;  %v335_v16 = vmul.f32 %v278_v41, %v190_v35  ;;  %v487_v18 = vpack.c.bf16 %v469_v8, %v468_v12  ;;  %v253_v35 = vpop.permute.xlu0 %252 }
  0xec   :  { %v486_v34 = vpack.c.bf16 %v467_v17, %v466_v22  ;;  %v330_v27 = vmul.f32 %v253_v35, %v1351_v25  ;;  %v462_v41 = vmax.f32 %v446_v36, 0.0  ;;  %v461_v43 = vmax.f32 %v445_v37, 0.0  ;;  %v1030_v25 = vld [vmem:[%s1385_s4 + $0x8] sm:$0xff]  }
  0xed   :  { %v471_v4 = vmax.f32 %v455_v63, 0.0  ;;  %v489_v5 = vpack.c.bf16 %v473_v62, %v472_v61  ;;  %v447_v31 = vadd.f32 %v390_v48, %v335_v16  ;;  %v258_v30 = vpop.permute.xlu1 %257  ;;  %v460_v46 = vmax.f32 %v444_v40, 0.0 }
  0xee   :  { %v331_v39 = vmul.f32 %v258_v30, %v1355_v29 }
  0xef   :  { %979 = vmatprep.subr.bf16.mxu1 %v489_v5  ;;  %v488_v10 = vpack.c.bf16 %v471_v4, %v470_v3  ;;  %v463_v38 = vmax.f32 %v447_v31, 0.0  ;;  %v365_v23 = vpop.permute.xlu0 %364  ;;  %v483_v49 = vpack.c.bf16 %v461_v43, %v460_v46 }
  0xf0   :  { %980 = vmatpush3.bf16.msra.mxu1 %v489_v5  ;;  %v442_v47 = vadd.f32 %v365_v23, %v330_v27 }
  0xf1   :  { %981 = vmatprep.subr.bf16.mxu1 %v488_v10  ;;  %v370_v42 = vpop.permute.xlu1 %369  ;;  %v484_v45 = vpack.c.bf16 %v463_v38, %v462_v41 }
  0xf2   :  { %v443_v44 = vadd.f32 %v370_v42, %v331_v39  ;;  %v458_v29 = vmax.f32 %v442_v47, 0.0 }
  0xf3   :  { %v620_v55 = vpop.permute.xlu0 %619 }
  0xf4   :  { %982 = vmatpush3.bf16.msra.mxu1 %v488_v10  ;;  %v459_v48 = vmax.f32 %v443_v44, 0.0 }
  0xf5   :  { %983 = vmatprep.subr.bf16.mxu1 %v487_v18  ;;  %v625_v54 = vpop.permute.xlu1 %624 }
  0xf6   :  { %v482_v50 = vpack.c.bf16 %v459_v48, %v458_v29 }
  0xf7   :  { %v676_v57 = vpop.permute.xlu0 %675 }
  0xf8   :  { %984 = vmatpush3.bf16.msra.mxu1 %v487_v18 }
  0xf9   :  { %985 = vmatprep.subr.bf16.mxu1 %v486_v34  ;;  %v681_v56 = vpop.permute.xlu1 %680 }
  0xfb   :  { %v610_v59 = vpop.permute.xlu0 %609 }
  0xfc   :  { %986 = vmatpush3.bf16.msra.mxu1 %v486_v34 }
  0xfd   :  { %987 = vmatprep.subr.bf16.mxu1 %v485_v32  ;;  %v615_v58 = vpop.permute.xlu1 %614 }
  0xff   :  { %v666_v61 = vpop.permute.xlu0 %665 }
 0x100   :  { %988 = vmatpush3.bf16.msra.mxu1 %v485_v32 }
 0x101   :  { %989 = vmatprep.subr.bf16.mxu1 %v484_v45  ;;  %v671_v60 = vpop.permute.xlu1 %670 }
 0x103   :  { %v600_v1 = vpop.permute.xlu0 %599 }
 0x104   :  { %990 = vmatpush3.bf16.msra.mxu1 %v484_v45  ;;  %v1034_v45 = vld [vmem:[%s1388_s7 + $0x8] sm:$0xff]   ;;  %s1062_s7 = smov [#allocation3]  }
 0x105   :  { %991 = vmatprep.subr.bf16.mxu1 %v483_v49  ;;  %v605_v63 = vpop.permute.xlu1 %604  ;;  %s900_s0 = sshll.u32 %s1062_s7, 4  ;;  %s901_s0 = int_to_ptr.vmem [resolvable:$true] %s900_s0 }
 0x106   :  { %s1039_s6 = scalar_lea.vmem %s901_s0, 16  ;;  %s1043_s17 = scalar_lea.vmem %s901_s0, 32 }
 0x107   :  { %v656_v7 = vpop.permute.xlu0 %655  ;;  %p1040_p0 = scmp.ne.s32.totalorder %s901_s0, %s1039_s6  ;;  %p1044_p1 = scmp.lt.s32.totalorder %s901_s0, %s901_s0 }
 0x108   :  { %992 = vmatpush3.bf16.msra.mxu1 %v483_v49  ;;  %p1045_p2 = scmp.lt.s32.totalorder %s1043_s17, %s1039_s6 }
 0x109   :  { %993 = vmatprep.subr.bf16.mxu1 %v482_v50  ;;  %v661_v4 = vpop.permute.xlu1 %660 }
 0x10a   :  { %p1046_p3 = por %p1045_p2, %p1044_p1 }
 0x10b   :  { %v590_v20 = vpop.permute.xlu0 %589 }
 0x10c   :  { %994 = vmatpush3.bf16.msra.mxu1 %v482_v50  ;;  %p1047_p4 = pnand %p1046_p3, %p1040_p0 }
 0x10d   :  { %v595_v14 = vpop.permute.xlu1 %594 }
 0x10f   :  { %996 = vmatmul.mubr.bf16.vlgmr.msra.gmra.mxu1 %v1030_v25  ;;  %v646_v32 = vpop.permute.xlu0 %645 }
 0x110   :  { %999 = vmatprep.mubr.bf16.mxu1 %v1031_v51 }
 0x111   :  { %v651_v35 = vpop.permute.xlu1 %650 }
 0x113   :  { %v780_v23 = vpop.permute.xlu0 %779 }
 0x115   :  { %v785_v46 = vpop.permute.xlu1 %784 }
 0x117   :  { %1000 = vmatmul.mubr.bf16.gmra.mxu1 %v1032_v52  ;;  %v790_v47 = vpop.permute.xlu0 %789 }
 0x119   :  { %v808_v48 = vpop.permute.xlu1 %807 }
 0x11b   :  { %v813_v49 = vpop.permute.xlu0 %812 }
 0x11d   :  { %v795_v29 = vpop.permute.xlu1 %794 }
 0x11f   :  { %v818_v50 = vpop.permute.xlu0 %817 }
 0x121   :  { %v823_v52 = vpop.permute.xlu1 %822 }
 0x1cf   :  { %v997_v62 = vpop.f32.mrf.mxu1 }
 0x1d0   :  { %v629_v15 = vmul.f32 %v997_v62, %v600_v1 }
 0x1d1   :  { %v548_v0 = vpop.f32.mrf.mxu1 }
 0x1d2   :  { %v685_v34 = vadd.f32 %v656_v7, %v629_v15  ;;  %v627_v30 = vmul.f32 %v590_v20, %v548_v0  ;;  %v845_v0 = vpop.permute.xlu1 %844 }
 0x1d3   :  { %v998_v2 = vpop.f32.mrf.mxu1 }
 0x1d4   :  { %v630_v10 = vmul.f32 %v998_v2, %v605_v63  ;;  %v693_v40 = vmax.f32 %v685_v34, 0.0  ;;  %v683_v27 = vadd.f32 %v646_v32, %v627_v30 }
 0x1d5   :  { %v551_v3 = vpop.f32.mrf.mxu1 }
 0x1d6   :  { %v686_v21 = vadd.f32 %v661_v4, %v630_v10  ;;  %v628_v22 = vmul.f32 %v595_v14, %v551_v3  ;;  %v691_v43 = vmax.f32 %v683_v27, 0.0 }
 0x1d7   :  { %v1001_v5 = vpop.f32.mrf.mxu1 }
 0x1d8   :  { %v633_v6 = vmul.f32 %v1001_v5, %v620_v55  ;;  %v694_v37 = vmax.f32 %v686_v21, 0.0  ;;  %v684_v39 = vadd.f32 %v651_v35, %v628_v22 }
 0x1d9   :  { %v564_v8 = vpop.f32.mrf.mxu1 }
 0x1da   :  { %v631_v9 = vmul.f32 %v610_v59, %v564_v8  ;;  %v689_v12 = vadd.f32 %v676_v57, %v633_v6  ;;  %v692_v41 = vmax.f32 %v684_v39, 0.0  ;;  %v704_v42 = vpack.c.bf16 %v694_v37, %v693_v40  ;;  %v840_v59 = vpop.permute.xlu0 %839 }
 0x1db   :  { %v1002_v11 = vpop.f32.mrf.mxu1 }
 0x1dc   :  { %v634_v13 = vmul.f32 %v1002_v11, %v625_v54  ;;  %v687_v17 = vadd.f32 %v666_v61, %v631_v9  ;;  %v697_v24 = vmax.f32 %v689_v12, 0.0  ;;  %v703_v44 = vpack.c.bf16 %v692_v41, %v691_v43  ;;  %v855_v9 = vpop.permute.xlu1 %854 }
 0x1dd   :  { %v567_v16 = vpop.f32.mrf.mxu1 }
 0x1de   :  { %v690_v18 = vadd.f32 %v681_v56, %v634_v13  ;;  %v632_v19 = vmul.f32 %v615_v58, %v567_v16  ;;  %v695_v28 = vmax.f32 %v687_v17, 0.0  ;;  %v850_v6 = vpop.permute.xlu0 %849  ;;  %v881_v17 = vlaneseq }
 0x1e0   :  { %v698_v26 = vmax.f32 %v690_v18, 0.0  ;;  %v688_v31 = vadd.f32 %v671_v60, %v632_v19  ;;  %v882_v20 = vshrl.u32 %v881_v17, 7 }
 0x1e2   :  { %v696_v33 = vmax.f32 %v688_v31, 0.0  ;;  %v706_v36 = vpack.c.bf16 %v698_v26, %v697_v24  ;;  %v883_v24 = vsub.s32 0, %v882_v20  ;;  %v879_v31 = vpop.permute.xlu0 %878 }
 0x1e4   :  { %1003 = vmatprep.subr.bf16.mxu0 %v706_v36  ;;  %v705_v38 = vpack.c.bf16 %v696_v33, %v695_v28  ;;  %v884_v30 = vrot.slane %v879_v31, %v883_v24 }
 0x1e5   :  { %1004 = vmatpush3.bf16.msra.mxu0 %v706_v36 }
 0x1e6   :  { %1005 = vmatprep.subr.bf16.mxu0 %v705_v38 }
 0x1e9   :  { %1006 = vmatpush3.bf16.msra.mxu0 %v705_v38 }
 0x1ea   :  { %1007 = vmatprep.subr.bf16.mxu0 %v704_v42 }
 0x1ed   :  { %1008 = vmatpush3.bf16.msra.mxu0 %v704_v42 }
 0x1ee   :  { %1009 = vmatprep.subr.bf16.mxu0 %v703_v44 }
 0x1f1   :  { %1010 = vmatpush3.bf16.msra.mxu0 %v703_v44 }
 0x1f4   :  { %1012 = vmatmul.mubr.msk.bf16.vlgmr.msra.gmra.mxu0 %vm717_vm2, %v1034_v45 }
 0x2b4   :  { %v1013_v25 = vpop.f32.mrf.mxu0 }
 0x2b5   :  { %v799_v51 = vmul.f32 %v1013_v25, %v790_v47 }
 0x2b6   :  { %v758_v53 = vpop.f32.mrf.mxu0 }
 0x2b7   :  { %v797_v54 = vmul.f32 %v780_v23, %v758_v53  ;;  %v827_v56 = vadd.f32 %v818_v50, %v799_v51 }
 0x2b8   :  { %v1014_v55 = vpop.f32.mrf.mxu0 }
 0x2b9   :  { %v825_v57 = vadd.f32 %v808_v48, %v797_v54  ;;  %v800_v58 = vmul.f32 %v1014_v55, %v795_v29  ;;  %v831_v1 = vmax.f32 %v827_v56, 0.0 }
 0x2ba   :  { %v761_v60 = vpop.f32.mrf.mxu0 }
 0x2bb   :  { %v829_v61 = vmax.f32 %v825_v57, 0.0  ;;  %v828_v62 = vadd.f32 %v823_v52, %v800_v58  ;;  %v798_v63 = vmul.f32 %v785_v46, %v761_v60  ;;  %v859_v7 = vmul.f32 %v850_v6, %v831_v1 }
 0x2bd   :  { %v826_v2 = vadd.f32 %v813_v49, %v798_v63  ;;  %v857_v3 = vmul.f32 %v840_v59, %v829_v61  ;;  %v832_v4 = vmax.f32 %v828_v62, 0.0  ;;  %v865_v14 = vsel %vm861_vm3, %v859_v7, 0.0 }
 0x2bf   :  { %v830_v5 = vmax.f32 %v826_v2, 0.0  ;;  %v862_v10 = vsel %vm861_vm3, %v857_v3, 0.0  ;;  %v860_v11 = vmul.f32 %v855_v9, %v832_v4 }
 0x2c1   :  { %v858_v8 = vmul.f32 %v845_v0, %v830_v5  ;;  %v867_v16 = vsel %vm861_vm3, %v860_v11, 0.0 }
 0x2c3   :  { %v863_v12 = vsel %vm861_vm3, %v858_v8, 0.0 }
 0x2c4   :  { %v864_v13 = vadd.f32 %v863_v12, %v862_v10 }
 0x2c6   :  { %v866_v15 = vadd.f32 %v865_v14, %v864_v13 }
 0x2c8   :  { %v868_v18 = vadd.f32 %v867_v16, %v866_v15 }
 0x2ca   :  { %v869_v19 = vrot.slane %v868_v18, 4 }
 0x2cc   :  { %v870_v21 = vadd.f32 %v869_v19, %v868_v18 }
 0x2ce   :  { %v871_v22 = vrot.slane %v870_v21, 2 }
 0x2d0   :  { %v872_v26 = vadd.f32 %v871_v22, %v870_v21 }
 0x2d2   :  { %v873_v34 = vrot.slane %v872_v26, 1 }
 0x2d4   :  { %v874_v28 = vadd.f32 %v873_v34, %v872_v26 }
 0x2d6   :  { %v885_v33 = vadd.f32 %v884_v30, %v874_v28 }
 0x2d8   :  { %v933_v36 = vmul.f32 -1.442695, %v885_v33 }
 0x2da   :  { %1035 = vpow2.f32 %v933_v36 }
 0x2e7   :  { %v1036_v35 = vpop.eup %1035 }
 0x2e8   :  { %v889_v37 = vadd.f32 1.0, %v1036_v35 }
 0x2ea   :  { %1037 = vrcp.f32 %v889_v37 }
 0x2f7   :  { %v1038_v39 = vpop.eup %1037 }
 0x2f8   :  { %893 = vst.msk [vmem:[#allocation3] sm:$0x1] %vm892_vm4, %v1038_v39 }
 0x2f9   :  { %1050 = shalt.err (!%p1047_p4)
}
 0x2fa   :  { %903 = dma.vmem_to_hbm [thread:$0]  %s901_s0, 16, %s1393_s12, [#allocation4]  }
 0x2fb   :  { %1059 = dma.done.wait [#allocation4], 16  }
 0x2fc   :  { %1060 = vsyncadd [#allocation4], 4294967280 }
 0x2fd   :  { %907 = vsyncpa [#allocation4], 1 }

</bundles_post_ra>
